<compile_context>
chip_gen: v5e
topology: v5e:2x2
jax: 0.10.0
libtpu: 0.0.40
codegen_flags: <defaults>
</compile_context>

<pallas_src>
import functools
import math

import jax
import jax.numpy as jnp
from jax import lax
from jax.experimental import pallas as pl
from jax.experimental.pallas import tpu as pltpu


# ---------------------------------------------------------------------------
# Tiling helpers
# ---------------------------------------------------------------------------

_MAX_BLOCK_BYTES = 2 * 1024 * 1024   # per-block budget (Pallas double-buffers each)
_MAX_TILE_TOKENS = 1024              # 512-2048 token tiles ~ HBM roofline
_VMEM_LIMIT = 32 * 1024 * 1024       # safe on v5e/v6e (128 MiB) and v7x (64 MiB)


def _round_up(x, m):
    return ((x + m - 1) // m) * m


def _choose_tile_n(n_tokens, feat, dtype_bytes):
    """Largest token tile that keeps one (tile_n, D) block within budget."""
    per_row = max(1, feat * dtype_bytes)
    tile = _MAX_BLOCK_BYTES // per_row
    tile = max(8, min(_MAX_TILE_TOKENS, tile))
    tile = max(8, (tile // 8) * 8)                 # (8, 128) second-minor rule
    tile = min(tile, _round_up(n_tokens, 8))       # don't exceed (padded) tokens
    return tile


def _pad_tokens(x2, tile_n):
    n = x2.shape[0]
    n_pad = _round_up(n, tile_n)
    if n_pad != n:
        x2 = jnp.pad(x2, ((0, n_pad - n), (0, 0)))
    return x2, n_pad


# ---------------------------------------------------------------------------
# Kernel 1: LayerNorm (pre-norm), torch semantics: unbiased std, /(std+eps)
# ---------------------------------------------------------------------------

def _layernorm_kernel(x_ref, g_ref, b_ref, o_ref, *, eps):
    x = x_ref[...].astype(jnp.float32)                      # (tile_n, D)
    d = x.shape[-1]
    mean = jnp.mean(x, axis=-1, keepdims=True)
    xc = x - mean
    # torch.Tensor.std defaults to the unbiased estimator (ddof = 1).
    denom = jnp.float32(d - 1) if d > 1 else jnp.float32(1)
    var = jnp.sum(xc * xc, axis=-1, keepdims=True) / denom
    std = jnp.sqrt(var)
    y = (g_ref[...].astype(jnp.float32) * xc / (std + eps)
         + b_ref[...].astype(jnp.float32))
    o_ref[...] = y.astype(o_ref.dtype)


def layernorm_pallas(x2, gamma, beta, *, eps=1e-6):
    n, d = x2.shape
    dtype_bytes = x2.dtype.itemsize
    tile_n = _choose_tile_n(n, d, max(dtype_bytes, 4))
    xp, n_pad = _pad_tokens(x2, tile_n)
    grid = (n_pad // tile_n,)

    g2 = gamma.reshape(1, d)
    b2 = beta.reshape(1, d)

    out = pl.pallas_call(
        functools.partial(_layernorm_kernel, eps=float(eps)),
        out_shape=jax.ShapeDtypeStruct((n_pad, d), x2.dtype),
        grid_spec=pltpu.PrefetchScalarGridSpec(
            num_scalar_prefetch=0,
            grid=grid,
            in_specs=[
                pl.BlockSpec((tile_n, d), lambda i: (i, 0)),
                pl.BlockSpec((1, d), lambda i: (0, 0)),       # gamma: resident
                pl.BlockSpec((1, d), lambda i: (0, 0)),       # beta:  resident
            ],
            out_specs=pl.BlockSpec((tile_n, d), lambda i: (i, 0)),
        ),
        compiler_params=pltpu.CompilerParams(
            dimension_semantics=("parallel",),
            vmem_limit_bytes=_VMEM_LIMIT),
        cost_estimate=pl.CostEstimate(
            flops=8 * n_pad * d,
            transcendentals=2 * n_pad,
            bytes_accessed=(2 * n_pad * d + 2 * d) * dtype_bytes),
    )(xp, g2, b2)
    return out[:n] if n_pad != n else out


# ---------------------------------------------------------------------------
# Kernel 2: dropout (training only) + residual add, fused
# ---------------------------------------------------------------------------

def _hash_u32(x):
    """lowbias32 integer finalizer: uniform 32-bit mixing, pure VPU int ops."""
    x = x ^ (x >> 16)
    x = x * jnp.uint32(0x7FEB352D)
    x = x ^ (x >> 15)
    x = x * jnp.uint32(0x846CA68B)
    x = x ^ (x >> 16)
    return x


def _residual_dropout_kernel(seed_ref, x_ref, s_ref, o_ref, *, p, training, tile_n):
    x = x_ref[...].astype(jnp.float32)
    s = s_ref[...].astype(jnp.float32)
    if training and p > 0.0:
        # Counter-based PRNG: hash(seed, global_row, col) -> uniform u32.
        # Portable (lowers on TPU and in interpret mode), no extra HBM traffic.
        seed_u = seed_ref[0].astype(jnp.uint32)
        row_start = (pl.program_id(0) * tile_n).astype(jnp.uint32)
        rows = lax.broadcasted_iota(jnp.int32, s.shape, 0).astype(jnp.uint32)
        cols = lax.broadcasted_iota(jnp.int32, s.shape, 1).astype(jnp.uint32)
        ctr = ((rows + row_start) * jnp.uint32(0x9E3779B1)
               ^ cols * jnp.uint32(0x85EBCA77)
               ^ seed_u * jnp.uint32(0xC2B2AE3D))
        bits = _hash_u32(_hash_u32(ctr))
        bits24 = (bits >> 8).astype(jnp.int32)                # uniform in [0, 2^24)
        threshold = jnp.int32(int(round(p * (1 << 24))))
        keep = bits24 >= threshold                            # keep prob = 1 - p
        s = jnp.where(keep, s * (1.0 / (1.0 - p)), 0.0)
    o_ref[...] = (x + s).astype(o_ref.dtype)


def residual_dropout_add_pallas(x2, s2, *, p=0.0, training=False, seed=0):
    n, d = x2.shape
    dtype_bytes = x2.dtype.itemsize
    tile_n = _choose_tile_n(n, d, max(dtype_bytes, 4))
    xp, n_pad = _pad_tokens(x2, tile_n)
    sp, _ = _pad_tokens(s2, tile_n)
    grid = (n_pad // tile_n,)
    seed_arr = jnp.asarray([seed], dtype=jnp.int32)

    out = pl.pallas_call(
        functools.partial(_residual_dropout_kernel,
                          p=float(p), training=bool(training), tile_n=tile_n),
        out_shape=jax.ShapeDtypeStruct((n_pad, d), x2.dtype),
        grid_spec=pltpu.PrefetchScalarGridSpec(
            num_scalar_prefetch=1,                     # dropout seed -> SMEM
            grid=grid,
            in_specs=[
                pl.BlockSpec((tile_n, d), lambda i, seed: (i, 0)),
                pl.BlockSpec((tile_n, d), lambda i, seed: (i, 0)),
            ],
            out_specs=pl.BlockSpec((tile_n, d), lambda i, seed: (i, 0)),
        ),
        compiler_params=pltpu.CompilerParams(
            dimension_semantics=("parallel",),
            vmem_limit_bytes=_VMEM_LIMIT),
        cost_estimate=pl.CostEstimate(
            flops=4 * n_pad * d,
            transcendentals=0,
            bytes_accessed=3 * n_pad * d * dtype_bytes),
    )(seed_arr, xp, sp)
    return out[:n] if n_pad != n else out


# ---------------------------------------------------------------------------
# SublayerConnection.forward
# ---------------------------------------------------------------------------

def sublayer_connection(x, sublayer, gamma, beta, *, eps=1e-6, dropout_p=0.0,
                        training=False, seed=0):
    """out = x + dropout(sublayer(LayerNorm(x)))  (PyTorch SublayerConnection)."""
    orig_shape = x.shape
    d = orig_shape[-1]
    n = math.prod(orig_shape[:-1])
    x2 = x.reshape(n, d)

    normed = layernorm_pallas(x2, gamma, beta, eps=eps)
    # TODO(synk): the arbitrary `sublayer` callable (attention / FFN / ...) has
    # no generic Pallas equivalent; it is applied as plain JAX between kernels.
    s = sublayer(normed.reshape(orig_shape)).reshape(n, d)
    out = residual_dropout_add_pallas(x2, s, p=dropout_p, training=training,
                                      seed=seed)
    return out.reshape(orig_shape)


# ---------------------------------------------------------------------------
# Demo / correctness check
# ---------------------------------------------------------------------------

if __name__ == "__main__":
    key = jax.random.PRNGKey(0)
    B, S, D = 2, 8, 128
    k_x, k_w, k_g, k_b = jax.random.split(key, 4)

    x = jax.random.normal(k_x, (B, S, D), dtype=jnp.float32)
    w = jax.random.normal(k_w, (D, D), dtype=jnp.float32) / jnp.sqrt(D)
    gamma = 1.0 + 0.1 * jax.random.normal(k_g, (D,), dtype=jnp.float32)
    beta = 0.05 * jax.random.normal(k_b, (D,), dtype=jnp.float32)
    eps = 1e-6

    sublayer = lambda y: jax.nn.relu(y @ w)   # example sublayer (plain JAX)

    # Eval mode (dropout = identity): deterministic, check vs pure-JAX reference.
    out = sublayer_connection(x, sublayer, gamma, beta, eps=eps,
                              dropout_p=0.1, training=False)
    out = jax.block_until_ready(out)

    def reference(xr):
        mean = xr.mean(-1, keepdims=True)
        std = jnp.std(xr, axis=-1, ddof=1, keepdims=True)   # torch unbiased std
        normed = gamma * (xr - mean) / (std + eps) + beta
        return xr + sublayer(normed)

    ref = reference(x)
    assert out.shape == x.shape
    max_err = float(jnp.max(jnp.abs(out - ref)))
    assert jnp.allclose(out, ref, rtol=1e-5, atol=1e-5), max_err

    # Training mode: exercises the in-kernel hash-PRNG dropout path.
    out_tr = sublayer_connection(x, sublayer, gamma, beta, eps=eps,
                                 dropout_p=0.1, training=True, seed=1234)
    out_tr = jax.block_until_ready(out_tr)
    assert out_tr.shape == x.shape
    assert bool(jnp.all(jnp.isfinite(out_tr)))

    print("KERNEL_OK")
</pallas_src>

<mosaic_0001>
module attributes {stable_mosaic.version = 11 : i64} {
  func.func @_layernorm_kernel(%arg0: i32, %arg1: memref<16x128xf32, #tpu.memory_space<vmem>>, %arg2: memref<1x128xf32, #tpu.memory_space<vmem>>, %arg3: memref<1x128xf32, #tpu.memory_space<vmem>>, %arg4: memref<16x128xf32, #tpu.memory_space<vmem>>) attributes {dimension_semantics = [#tpu.dimension_semantics<parallel>], iteration_bounds = array<i64: 1>, scalar_prefetch = 0 : i64, scratch_operands = 0 : i64, tpu.core_type = #tpu.core_type<tc>, window_params = [{transform_indices = @transform_0, window_bounds = array<i64: 16, 128>}, {pipeline_mode = #tpu.pipeline_mode<synchronous>, transform_indices = @transform_1, window_bounds = array<i64: 1, 128>}, {pipeline_mode = #tpu.pipeline_mode<synchronous>, transform_indices = @transform_2, window_bounds = array<i64: 1, 128>}, {transform_indices = @transform_3, window_bounds = array<i64: 16, 128>}]} {
    %c0 = arith.constant 0 : index
    %c0_0 = arith.constant 0 : index
    %0 = vector.load %arg1[%c0, %c0_0] : memref<16x128xf32, #tpu.memory_space<vmem>>, vector<16x128xf32>
    %cst = arith.constant dense<0.000000e+00> : vector<16xf32>
    %1 = vector.multi_reduction <add>, %0, %cst [1] : vector<16x128xf32> to vector<16xf32>
    %2 = vector.shape_cast %1 : vector<16xf32> to vector<16x1xf32>
    %cst_1 = arith.constant 1.280000e+02 : f32
    %3 = vector.broadcast %cst_1 : f32 to vector<16x1xf32>
    %4 = arith.divf %2, %3 : vector<16x1xf32>
    %5 = vector.broadcast %4 : vector<16x1xf32> to vector<16x128xf32>
    %6 = arith.subf %0, %5 : vector<16x128xf32>
    %7 = arith.mulf %6, %6 : vector<16x128xf32>
    %cst_2 = arith.constant dense<0.000000e+00> : vector<16xf32>
    %8 = vector.multi_reduction <add>, %7, %cst_2 [1] : vector<16x128xf32> to vector<16xf32>
    %9 = vector.shape_cast %8 : vector<16xf32> to vector<16x1xf32>
    %cst_3 = arith.constant 1.270000e+02 : f32
    %10 = vector.broadcast %cst_3 : f32 to vector<16x1xf32>
    %11 = arith.divf %9, %10 : vector<16x1xf32>
    %12 = math.sqrt %11 : vector<16x1xf32>
    %c0_4 = arith.constant 0 : index
    %c0_5 = arith.constant 0 : index
    %13 = vector.load %arg2[%c0_4, %c0_5] : memref<1x128xf32, #tpu.memory_space<vmem>>, vector<1x128xf32>
    %14 = vector.broadcast %13 : vector<1x128xf32> to vector<16x128xf32>
    %15 = arith.mulf %14, %6 : vector<16x128xf32>
    %cst_6 = arith.constant 9.99999997E-7 : f32
    %16 = vector.broadcast %cst_6 : f32 to vector<16x1xf32>
    %17 = arith.addf %12, %16 : vector<16x1xf32>
    %18 = vector.broadcast %17 : vector<16x1xf32> to vector<16x128xf32>
    %19 = arith.divf %15, %18 : vector<16x128xf32>
    %c0_7 = arith.constant 0 : index
    %c0_8 = arith.constant 0 : index
    %20 = vector.load %arg3[%c0_7, %c0_8] : memref<1x128xf32, #tpu.memory_space<vmem>>, vector<1x128xf32>
    %21 = vector.broadcast %20 : vector<1x128xf32> to vector<16x128xf32>
    %22 = arith.addf %19, %21 : vector<16x128xf32>
    %c0_9 = arith.constant 0 : index
    %c0_10 = arith.constant 0 : index
    %23 = vector.load %arg4[%c0_9, %c0_10] : memref<16x128xf32, #tpu.memory_space<vmem>>, vector<16x128xf32>
    tpu.vector_store %arg4[%c0_9, %c0_10], %22 {strides = array<i32>} : memref<16x128xf32, #tpu.memory_space<vmem>>, vector<16x128xf32>,
    return
  }
  func.func @transform_0(%arg0: i32) -> (i32, i32) {
    %c0_i32 = arith.constant 0 : i32
    %c0_i32_0 = arith.constant 0 : i32
    return %arg0, %c0_i32 : i32, i32
  }
  func.func @transform_1(%arg0: i32) -> (i32, i32) {
    %c0_i32 = arith.constant 0 : i32
    %c0_i32_0 = arith.constant 0 : i32
    %c0_i32_1 = arith.constant 0 : i32
    return %c0_i32, %c0_i32_0 : i32, i32
  }
  func.func @transform_2(%arg0: i32) -> (i32, i32) {
    %c0_i32 = arith.constant 0 : i32
    %c0_i32_0 = arith.constant 0 : i32
    %c0_i32_1 = arith.constant 0 : i32
    return %c0_i32, %c0_i32_0 : i32, i32
  }
  func.func @transform_3(%arg0: i32) -> (i32, i32) {
    %c0_i32 = arith.constant 0 : i32
    %c0_i32_0 = arith.constant 0 : i32
    return %arg0, %c0_i32 : i32, i32
  }
}

</mosaic_0001>

<bundles_post_ra>
// kernel: tpu_custom_call.1
= control target key start
LH: loop header
LB: loop body
LE: loop exit
PB: predicated region body
PF: predicated region fallthrough
CT: control target
= control target key end

     0   :  { %8 = vsyncpa [#allocation3], 0  ;;  %s321_s0 = inlined_call_operand.hbm [shape: f32[16,128], index: 0, kind: input, shape index: {}]   ;;  %s322_s1 = inlined_call_operand.hbm [shape: f32[1,128], index: 1, kind: input, shape index: {}]   ;;  %s323_s2 = inlined_call_operand.vmem [shape: f32[1,128], index: 2, kind: input, shape index: {}]   ;;  %s324_s3 = inlined_call_operand.hbm [shape: f32[16,128], index: 3, kind: output, shape index: {}]  }
   0x1   :  { %9 = vsyncpa [#allocation6], 0 }
   0x2   :  { %10 = vsyncpa [#allocation4], 0  ;;  %s15_s14 = sshll.u32 %s321_s0, 4  ;;  %s266_s15 = smov [#allocation2]   ;;  %s16_s14 = int_to_ptr.hbm [resolvable:$true] %s15_s14 }
   0x3   :  { %s17_s16 = sshll.u32 %s266_s15, 4  ;;  %s29_s19 = sshll.u32 %s322_s1, 4  ;;  %s18_s16 = int_to_ptr.vmem [resolvable:$true] %s17_s16  ;;  %s30_s19 = int_to_ptr.hbm [resolvable:$true] %s29_s19 }
   0x4   :  { %s267_s20 = smov 128   ;;  %s268_s21 = smov 8  }
   0x5   :  { %23 = dma.hbm_to_vmem [thread:$0]  %s16_s14, 256, %s18_s16, [#allocation3], %s267_s20, %s267_s20, %s268_s21  }
   0x6   :  { %s269_s22 = smov [#allocation5]  }
   0x7   :  { %s31_s23 = sshll.u32 %s269_s22, 4  ;;  %s32_s23 = int_to_ptr.vmem [resolvable:$true] %s31_s23 }
   0x8   :  { %34 = dma.hbm_to_vmem [thread:$0]  %s30_s19, 16, %s32_s23, [#allocation6]  }
   0x9   :  { %260 = dma.done.wait [#allocation3], 256  }
   0xa   :  { %261 = vsyncadd [#allocation3], 4294967040 }
   0xb   :  { %262 = dma.done.wait [#allocation6], 16  }
   0xc   :  { %263 = vsyncadd [#allocation6], 4294967280  ;;  %v45_v0 = vld [vmem:[#allocation2] sm:$0xff]  ;;  %v46_v1 = vld [vmem:[#allocation2 + $0x8] sm:$0xff]  ;;  %v270_v2 = vmov 128.0   ;;  %v271_v17 = vmov 127.0  }
   0xd   :  { %47 = vadd.xlane.f32.xlu0 %v45_v0  ;;  %176 = vrcp.f32 %v270_v2  ;;  %v174_v54 = vld [vmem:[#allocation5] ss:$0 sm:$0xff]  ;;  %v175_v63 = vld [vmem:[%s323_s2] ss:$0 sm:$0xff]  ;;  %s272_s24 = smov [#allocation7]   ;;  %s153_s27 = sshll.u32 %s324_s3, 4  ;;  %s154_s27 = int_to_ptr.hbm [resolvable:$true] %s153_s27 }
   0xe   :  { %178 = vrcp.f32 %v271_v17  ;;  %s151_s2 = sshll.u32 %s272_s24, 4  ;;  %s152_s2 = int_to_ptr.vmem [resolvable:$true] %s151_s2 }
  0x13   :  { %v177_v3 = vpop.eup %176 }
  0x14   :  { %v52_v4 = vmul.f32 128.0, %v177_v3  ;;  %vm56_vm0 = vweird.f32 %v177_v3  ;;  %v179_v18 = vpop.eup %178 }
  0x15   :  { %49 = vadd.xlane.f32.xlu0 %v46_v1  ;;  %v69_v19 = vmul.f32 127.0, %v179_v18  ;;  %vm73_vm1 = vweird.f32 %v179_v18 }
  0x16   :  { %v53_v5 = vsub.f32 1.0, %v52_v4 }
  0x17   :  { %v70_v20 = vsub.f32 1.0, %v69_v19 }
  0x18   :  { %v54_v6 = vmul.f32 %v177_v3, %v53_v5 }
  0x19   :  { %v71_v21 = vmul.f32 %v179_v18, %v70_v20 }
  0x1a   :  { %v55_v7 = vadd.f32 %v177_v3, %v54_v6 }
  0x1b   :  { %v72_v22 = vadd.f32 %v179_v18, %v71_v21 }
  0x1c   :  { %v57_v8 = vsel %vm56_vm0, %v177_v3, %v55_v7 }
  0x1d   :  { %v74_v23 = vsel %vm73_vm1, %v179_v18, %v72_v22 }
  0x80   :  { %v48_v9 = vpop.xlane.xlu0 %47 }
  0x81   :  { %v58_v10 = vmul.f32 %v57_v8, %v48_v9 }
  0x83   :  { %v302_v11 = vsub.f32 %v45_v0, %v58_v10 }
  0x85   :  { %v62_v12 = vmul.f32 %v302_v11, %v302_v11  ;;  %v105_v60 = vmul.f32 %v174_v54, %v302_v11 }
  0x87   :  { %64 = vadd.xlane.f32.xlu1 %v62_v12 }
  0x88   :  { %v50_v13 = vpop.xlane.xlu0 %49 }
  0x89   :  { %v59_v14 = vmul.f32 %v57_v8, %v50_v13 }
  0x8b   :  { %v306_v15 = vsub.f32 %v46_v1, %v59_v14 }
  0x8d   :  { %v63_v16 = vmul.f32 %v306_v15, %v306_v15  ;;  %v106_v9 = vmul.f32 %v174_v54, %v306_v15 }
  0x8f   :  { %66 = vadd.xlane.f32.xlu1 %v63_v16 }
  0xfa   :  { %v65_v24 = vpop.xlane.xlu1 %64 }
  0xfb   :  { %v75_v25 = vmul.f32 %v74_v23, %v65_v24 }
  0xfd   :  { %180 = vrsqrt.f32 %v75_v25  ;;  %vm84_vm2 = vcmp.eq.f32.partialorder %v75_v25, inf  ;;  %v87_v38 = vand.u32 2147483648, %v75_v25  ;;  %vm86_vm3 = vcmp.eq.f32.partialorder %v75_v25, 0.0 }
 0x102   :  { %v67_v26 = vpop.xlane.xlu1 %66 }
 0x103   :  { %v181_v27 = vpop.eup %180  ;;  %v76_v28 = vmul.f32 %v74_v23, %v67_v26 }
 0x104   :  { %v78_v29 = vmul.f32 %v181_v27, %v75_v25 }
 0x105   :  { %182 = vrsqrt.f32 %v76_v28  ;;  %vm96_vm4 = vcmp.eq.f32.partialorder %v76_v28, inf  ;;  %v99_v46 = vand.u32 2147483648, %v76_v28  ;;  %vm98_vm5 = vcmp.eq.f32.partialorder %v76_v28, 0.0 }
 0x106   :  { %v79_v30 = vmul.f32 %v181_v27, %v78_v29 }
 0x108   :  { %v80_v31 = vmul.f32 0.5, %v79_v30 }
 0x10a   :  { %v81_v32 = vsub.f32 1.5, %v80_v31 }
 0x10b   :  { %v183_v33 = vpop.eup %182 }
 0x10c   :  { %v82_v34 = vmul.f32 %v181_v27, %v81_v32  ;;  %v90_v35 = vmul.f32 %v183_v33, %v76_v28 }
 0x10e   :  { %v83_v36 = vmul.f32 %v82_v34, %v75_v25  ;;  %v91_v37 = vmul.f32 %v183_v33, %v90_v35 }
 0x110   :  { %v85_v39 = vsel %vm84_vm2, %v75_v25, %v83_v36  ;;  %v92_v40 = vmul.f32 0.5, %v91_v37 }
 0x111   :  { %v88_v41 = vsel %vm86_vm3, %v87_v38, %v85_v39 }
 0x112   :  { %v93_v42 = vsub.f32 1.5, %v92_v40  ;;  %v107_v43 = vadd.f32 1e-06, %v88_v41 }
 0x114   :  { %v94_v44 = vmul.f32 %v183_v33, %v93_v42  ;;  %184 = vrcp.f32 %v107_v43  ;;  %v120_v53 = vand.u32 2147483648, %v107_v43  ;;  %v118_v56 = vand.u32 2147483647, %v107_v43 }
 0x115   :  { %vm114_vm7 = vweird.f32 %v107_v43 }
 0x116   :  { %v95_v45 = vmul.f32 %v94_v44, %v76_v28  ;;  %v121_v59 = vor.u32 1.1754944e-38, %v120_v53  ;;  %vm119_vm9 = vcmp.eq.f32.partialorder %v118_v56, 8.507059e+37 }
 0x118   :  { %v97_v47 = vsel %vm96_vm4, %v76_v28, %v95_v45 }
 0x119   :  { %v100_v48 = vsel %vm98_vm5, %v99_v46, %v97_v47 }
 0x11a   :  { %v185_v49 = vpop.eup %184  ;;  %v108_v50 = vadd.f32 1e-06, %v100_v48 }
 0x11b   :  { %v110_v51 = vmul.f32 %v185_v49, %v107_v43  ;;  %vm115_vm6 = vweird.f32 %v185_v49 }
 0x11c   :  { %186 = vrcp.f32 %v108_v50  ;;  %vm116_vm8 = vmor %vm114_vm7, %vm115_vm6  ;;  %v135_v3 = vand.u32 2147483648, %v108_v50  ;;  %v133_v5 = vand.u32 2147483647, %v108_v50  ;;  %vm129_vm11 = vweird.f32 %v108_v50 }
 0x11d   :  { %v111_v52 = vsub.f32 1.0, %v110_v51 }
 0x11e   :  { %v136_v8 = vor.u32 1.1754944e-38, %v135_v3  ;;  %vm134_vm13 = vcmp.eq.f32.partialorder %v133_v5, 8.507059e+37 }
 0x11f   :  { %v112_v55 = vmul.f32 %v185_v49, %v111_v52 }
 0x121   :  { %v113_v57 = vadd.f32 %v185_v49, %v112_v55 }
 0x122   :  { %v187_v58 = vpop.eup %186 }
 0x123   :  { %v117_v61 = vsel %vm116_vm8, %v185_v49, %v113_v57  ;;  %v125_v62 = vmul.f32 %v187_v58, %v108_v50  ;;  %vm130_vm10 = vweird.f32 %v187_v58 }
 0x124   :  { %v122_v0 = vsel %vm119_vm9, %v121_v59, %v117_v61  ;;  %vm131_vm12 = vmor %vm129_vm11, %vm130_vm10 }
 0x125   :  { %v123_v1 = vmul.f32 %v122_v0, %v105_v60  ;;  %v126_v2 = vsub.f32 1.0, %v125_v62 }
 0x127   :  { %v127_v4 = vmul.f32 %v187_v58, %v126_v2  ;;  %v143_v6 = vadd.f32 %v175_v63, %v123_v1 }
 0x129   :  { %v128_v7 = vadd.f32 %v187_v58, %v127_v4  ;;  %145 = vst [vmem:[#allocation7] sm:$0xff] %v143_v6 }
 0x12b   :  { %v132_v10 = vsel %vm131_vm12, %v187_v58, %v128_v7 }
 0x12c   :  { %v137_v11 = vsel %vm134_vm13, %v136_v8, %v132_v10 }
 0x12d   :  { %v138_v12 = vmul.f32 %v137_v11, %v106_v9 }
 0x12f   :  { %v144_v13 = vadd.f32 %v175_v63, %v138_v12 }
 0x131   :  { %146 = vst [vmem:[#allocation7 + $0x8] sm:$0xff] %v144_v13 }
 0x132   :  { %159 = dma.vmem_to_hbm [thread:$0]  %s152_s2, 256, %s154_s27, [#allocation4], %s267_s20, %s267_s20, %s268_s21  }
 0x133   :  { %264 = dma.done.wait [#allocation4], 256  }
 0x134   :  { %265 = vsyncadd [#allocation4], 4294967040 }
 0x135   :  { %164 = vsyncpa [#allocation3], 1 }
 0x136   :  { %165 = vsyncpa [#allocation6], 1 }
 0x137   :  { %166 = vsyncpa [#allocation4], 1 }

</bundles_post_ra>
